<compile_context>
chip_gen: v5e
topology: v5e:2x2
jax: 0.10.0
libtpu: 0.0.40
codegen_flags: <defaults>
</compile_context>

<pallas_src>
import functools

import jax
import jax.numpy as jnp
from jax.experimental import pallas as pl
from jax.experimental.pallas import tpu as pltpu


def critic_kernel(s_ref, a_ref, w1s_ref, w1a_ref, b1_ref, w2_ref, b2_ref,
                  w3_ref, b3_ref, o_ref):
    # MXU operand dtype (f32 or bf16) is whatever the weights were cast to.
    cdt = w1s_ref.dtype
    s = s_ref[...].astype(cdt)            # (S, tb)  batch on lanes
    a = a_ref[...].astype(cdt)            # (A, tb)

    # Layer 1: fused concat -> split matmul (transposed).  f32 accumulate.
    h1 = (jnp.dot(w1s_ref[...], s, preferred_element_type=jnp.float32)
          + jnp.dot(w1a_ref[...], a, preferred_element_type=jnp.float32)
          + b1_ref[...])                  # (H, tb) + (H, 1) lane-broadcast
    h1 = jnp.maximum(h1, 0.0)             # ReLU (f32 VPU)

    # Layer 2.
    h2 = jnp.dot(w2_ref[...], h1.astype(cdt),
                 preferred_element_type=jnp.float32) + b2_ref[...]
    h2 = jnp.maximum(h2, 0.0)             # ReLU (f32 VPU)

    # Layer 3: (1, H) @ (H, tb) -> lane-dense (1, tb) output row.
    q = jnp.dot(w3_ref[...], h2.astype(cdt),
                preferred_element_type=jnp.float32) + b3_ref[...]
    o_ref[...] = q


def _round_up(x, m):
    return ((x + m - 1) // m) * m


@functools.partial(jax.jit, static_argnames=("tile_b", "compute_dtype"))
def critic_forward(state, action, params, *, tile_b=1024,
                   compute_dtype=jnp.bfloat16):
    """Pallas-backed Critic forward.  state: (B, S), action: (B, A) -> (B, 1)."""
    w1s, w1a, b1, w2, b2, w3, b3 = params
    state = state.astype(jnp.float32)
    action = action.astype(jnp.float32)
    B, S = state.shape
    A = action.shape[1]
    H = w2.shape[0]

    # Batch-on-lanes layout: transpose the tiny inputs in the wrapper.
    s_t = state.T                          # (S, B)
    a_t = action.T                         # (A, B)

    # Only MXU-operand weights change dtype; biases stay f32.
    w1s_c = w1s.astype(compute_dtype)
    w1a_c = w1a.astype(compute_dtype)
    w2_c = w2.astype(compute_dtype)
    w3_c = w3.astype(compute_dtype)

    # Batch tile (lane dim): must be a multiple of 128 unless it is the full
    # batch.  Aim for >= 2 grid steps so both v7x TensorCores get work.
    if B <= tile_b:
        tb = _round_up(-(-B // 2), 128)    # ceil(B/2) rounded up to 128
        if tb >= B:                        # cannot split and stay lane-aligned
            tb = B
    else:
        tb = max(128, (tile_b // 128) * 128)
    grid = (pl.cdiv(B, tb),)

    act_spec = lambda feat: pl.BlockSpec((feat, tb), lambda i: (0, i))
    # Weights / biases: constant block index -> fetched once, VMEM-resident,
    # single-buffered (no need to double-buffer a block that never changes).
    pin = lambda shape: pl.BlockSpec(shape, lambda i: (0, 0),
                                     pipeline_mode=pl.Buffered(buffer_count=1))

    out = pl.pallas_call(
        critic_kernel,
        out_shape=jax.ShapeDtypeStruct((1, B), jnp.float32),
        grid=grid,
        in_specs=[
            act_spec(S),              # state^T tile   (S, tb)
            act_spec(A),              # action^T tile  (A, tb)
            pin((H, S)),              # W1[:, :S]
            pin((H, A)),              # W1[:, S:]
            pin((H, 1)),              # b1 (column)
            pin((H, H)),              # W2
            pin((H, 1)),              # b2 (column)
            pin((1, H)),              # W3 row
            pin((1, 1)),              # b3
        ],
        out_specs=pl.BlockSpec((1, tb), lambda i: (0, i)),   # lane-dense row
        compiler_params=pltpu.CompilerParams(
            dimension_semantics=("parallel",)),
    )(s_t, a_t, w1s_c, w1a_c, b1, w2_c, b2, w3_c, b3)

    return out.reshape(B, 1)              # (1, B) -> (B, 1): layout-only


def xavier_uniform(key, fan_in, fan_out, shape):
    # matches torch.nn.init.xavier_uniform_ (gain=1)
    bound = jnp.sqrt(6.0 / (fan_in + fan_out))
    return jax.random.uniform(key, shape, jnp.float32, -bound, bound)


def init_critic_params(key, state_dim, action_dim, hidden_dim):
    """Weights in PyTorch (out_features, in_features) orientation, biases as columns."""
    in_dim = state_dim + action_dim
    k1, k2, k3 = jax.random.split(key, 3)
    w1 = xavier_uniform(k1, in_dim, hidden_dim, (hidden_dim, in_dim))
    w1s, w1a = w1[:, :state_dim], w1[:, state_dim:]
    b1 = jnp.full((hidden_dim, 1), 0.01, jnp.float32)
    w2 = xavier_uniform(k2, hidden_dim, hidden_dim, (hidden_dim, hidden_dim))
    b2 = jnp.full((hidden_dim, 1), 0.01, jnp.float32)
    w3 = xavier_uniform(k3, hidden_dim, 1, (1, hidden_dim))
    b3 = jnp.full((1, 1), 0.01, jnp.float32)
    return (w1s, w1a, b1, w2, b2, w3, b3)


def critic_reference(state, action, params):
    """Pure-JAX reference (standard row-major layout) for correctness check."""
    w1s, w1a, b1, w2, b2, w3, b3 = params
    h1 = jnp.maximum(state @ w1s.T + action @ w1a.T + b1.T, 0.0)
    h2 = jnp.maximum(h1 @ w2.T + b2.T, 0.0)
    return h2 @ w3.T + b3.T


if __name__ == "__main__":
    # Pendulum-v1: state_dim=3, action_dim=1
    state_dim, action_dim, hidden_dim, batch = 3, 1, 32, 8

    key = jax.random.PRNGKey(0)
    k_params, k_state, k_action = jax.random.split(key, 3)

    params = init_critic_params(k_params, state_dim, action_dim, hidden_dim)
    state = jax.random.normal(k_state, (batch, state_dim), jnp.float32)
    action = jax.random.normal(k_action, (batch, action_dim), jnp.float32)
    q_ref = critic_reference(state, action, params)

    # f32 MXU-operand path (tight tolerance vs. reference).
    q_f32 = jax.block_until_ready(
        critic_forward(state, action, params, compute_dtype=jnp.float32))
    assert q_f32.shape == (batch, 1)
    assert jnp.allclose(q_f32, q_ref, atol=2e-5, rtol=2e-5)

    # Default bf16 MXU-operand path (f32 accumulate) - looser tolerance.
    q_bf16 = jax.block_until_ready(critic_forward(state, action, params))
    assert jnp.allclose(q_bf16, q_ref, atol=5e-2, rtol=5e-2)

    # Larger batch: exercises the 2-step grid split (v7x) + partial last tile.
    kb_s, kb_a = jax.random.split(jax.random.PRNGKey(1))
    big_state = jax.random.normal(kb_s, (700, state_dim), jnp.float32)
    big_action = jax.random.normal(kb_a, (700, action_dim), jnp.float32)
    q_big_ref = critic_reference(big_state, big_action, params)

    q_big = jax.block_until_ready(
        critic_forward(big_state, big_action, params,
                       compute_dtype=jnp.float32))            # grid = (2,)
    assert jnp.allclose(q_big, q_big_ref, atol=2e-5, rtol=2e-5)

    q_big3 = jax.block_until_ready(
        critic_forward(big_state, big_action, params, tile_b=256,
                       compute_dtype=jnp.float32))            # grid = (3,)
    assert jnp.allclose(q_big3, q_big_ref, atol=2e-5, rtol=2e-5)

    print("KERNEL_OK")
</pallas_src>

<mosaic_0001>
module attributes {stable_mosaic.version = 11 : i64} {
  func.func @critic_kernel(%arg0: i32, %arg1: memref<3x8xf32, #tpu.memory_space<vmem>>, %arg2: memref<1x8xf32, #tpu.memory_space<vmem>>, %arg3: memref<32x3xf32, #tpu.memory_space<vmem>>, %arg4: memref<32x1xf32, #tpu.memory_space<vmem>>, %arg5: memref<32x1xf32, #tpu.memory_space<vmem>>, %arg6: memref<32x32xf32, #tpu.memory_space<vmem>>, %arg7: memref<32x1xf32, #tpu.memory_space<vmem>>, %arg8: memref<1x32xf32, #tpu.memory_space<vmem>>, %arg9: memref<1x1xf32, #tpu.memory_space<vmem>>, %arg10: memref<1x8xf32, #tpu.memory_space<vmem>>) attributes {dimension_semantics = [#tpu.dimension_semantics<parallel>], iteration_bounds = array<i64: 1>, scalar_prefetch = 0 : i64, scratch_operands = 0 : i64, tpu.core_type = #tpu.core_type<tc>, window_params = [{transform_indices = @transform_0, window_bounds = array<i64: 3, 8>}, {transform_indices = @transform_1, window_bounds = array<i64: 1, 8>}, {pipeline_mode = #tpu.pipeline_mode<synchronous>, transform_indices = @transform_2, window_bounds = array<i64: 32, 3>}, {pipeline_mode = #tpu.pipeline_mode<synchronous>, transform_indices = @transform_3, window_bounds = array<i64: 32, 1>}, {pipeline_mode = #tpu.pipeline_mode<synchronous>, transform_indices = @transform_4, window_bounds = array<i64: 32, 1>}, {pipeline_mode = #tpu.pipeline_mode<synchronous>, transform_indices = @transform_5, window_bounds = array<i64: 32, 32>}, {pipeline_mode = #tpu.pipeline_mode<synchronous>, transform_indices = @transform_6, window_bounds = array<i64: 32, 1>}, {pipeline_mode = #tpu.pipeline_mode<synchronous>, transform_indices = @transform_7, window_bounds = array<i64: 1, 32>}, {pipeline_mode = #tpu.pipeline_mode<synchronous>, transform_indices = @transform_8, window_bounds = array<i64: 1, 1>}, {transform_indices = @transform_9, window_bounds = array<i64: 1, 8>}]} {
    %c0 = arith.constant 0 : index
    %c0_0 = arith.constant 0 : index
    %0 = vector.load %arg1[%c0, %c0_0] : memref<3x8xf32, #tpu.memory_space<vmem>>, vector<3x8xf32>
    %c0_1 = arith.constant 0 : index
    %c0_2 = arith.constant 0 : index
    %1 = vector.load %arg2[%c0_1, %c0_2] : memref<1x8xf32, #tpu.memory_space<vmem>>, vector<1x8xf32>
    %c0_3 = arith.constant 0 : index
    %c0_4 = arith.constant 0 : index
    %2 = vector.load %arg3[%c0_3, %c0_4] : memref<32x3xf32, #tpu.memory_space<vmem>>, vector<32x3xf32>
    %cst = arith.constant dense<0.000000e+00> : vector<32x8xf32>
    %3 = tpu.matmul %2, %0, %cst {dimension_numbers = #tpu.dot_dimension_numbers<[1], [0], [0], [1], [0, 0, 1, 1], [], []>} : vector<32x3xf32>, vector<3x8xf32>, vector<32x8xf32> -> vector<32x8xf32>
    %c0_5 = arith.constant 0 : index
    %c0_6 = arith.constant 0 : index
    %4 = vector.load %arg4[%c0_5, %c0_6] : memref<32x1xf32, #tpu.memory_space<vmem>>, vector<32x1xf32>
    %cst_7 = arith.constant dense<0.000000e+00> : vector<32x8xf32>
    %5 = tpu.matmul %4, %1, %cst_7 {dimension_numbers = #tpu.dot_dimension_numbers<[1], [0], [0], [1], [0, 0, 1, 1], [], []>} : vector<32x1xf32>, vector<1x8xf32>, vector<32x8xf32> -> vector<32x8xf32>
    %6 = arith.addf %3, %5 : vector<32x8xf32>
    %c0_8 = arith.constant 0 : index
    %c0_9 = arith.constant 0 : index
    %7 = vector.load %arg5[%c0_8, %c0_9] : memref<32x1xf32, #tpu.memory_space<vmem>>, vector<32x1xf32>
    %8 = vector.broadcast %7 : vector<32x1xf32> to vector<32x8xf32>
    %9 = arith.addf %6, %8 : vector<32x8xf32>
    %cst_10 = arith.constant 0.000000e+00 : f32
    %10 = vector.broadcast %cst_10 : f32 to vector<32x8xf32>
    %11 = arith.maximumf %9, %10 : vector<32x8xf32>
    %c0_11 = arith.constant 0 : index
    %c0_12 = arith.constant 0 : index
    %12 = vector.load %arg6[%c0_11, %c0_12] : memref<32x32xf32, #tpu.memory_space<vmem>>, vector<32x32xf32>
    %cst_13 = arith.constant dense<0.000000e+00> : vector<32x8xf32>
    %13 = tpu.matmul %12, %11, %cst_13 {dimension_numbers = #tpu.dot_dimension_numbers<[1], [0], [0], [1], [0, 0, 1, 1], [], []>} : vector<32x32xf32>, vector<32x8xf32>, vector<32x8xf32> -> vector<32x8xf32>
    %c0_14 = arith.constant 0 : index
    %c0_15 = arith.constant 0 : index
    %14 = vector.load %arg7[%c0_14, %c0_15] : memref<32x1xf32, #tpu.memory_space<vmem>>, vector<32x1xf32>
    %15 = vector.broadcast %14 : vector<32x1xf32> to vector<32x8xf32>
    %16 = arith.addf %13, %15 : vector<32x8xf32>
    %cst_16 = arith.constant 0.000000e+00 : f32
    %17 = vector.broadcast %cst_16 : f32 to vector<32x8xf32>
    %18 = arith.maximumf %16, %17 : vector<32x8xf32>
    %c0_17 = arith.constant 0 : index
    %c0_18 = arith.constant 0 : index
    %19 = vector.load %arg8[%c0_17, %c0_18] : memref<1x32xf32, #tpu.memory_space<vmem>>, vector<1x32xf32>
    %cst_19 = arith.constant dense<0.000000e+00> : vector<1x8xf32>
    %20 = tpu.matmul %19, %18, %cst_19 {dimension_numbers = #tpu.dot_dimension_numbers<[1], [0], [0], [1], [0, 0, 1, 1], [], []>} : vector<1x32xf32>, vector<32x8xf32>, vector<1x8xf32> -> vector<1x8xf32>
    %c0_20 = arith.constant 0 : index
    %c0_21 = arith.constant 0 : index
    %21 = vector.load %arg9[%c0_20, %c0_21] : memref<1x1xf32, #tpu.memory_space<vmem>>, vector<1x1xf32>
    %22 = vector.broadcast %21 : vector<1x1xf32> to vector<1x8xf32>
    %23 = arith.addf %20, %22 : vector<1x8xf32>
    %c0_22 = arith.constant 0 : index
    %c0_23 = arith.constant 0 : index
    %24 = vector.load %arg10[%c0_22, %c0_23] : memref<1x8xf32, #tpu.memory_space<vmem>>, vector<1x8xf32>
    tpu.vector_store %arg10[%c0_22, %c0_23], %23 {strides = array<i32>} : memref<1x8xf32, #tpu.memory_space<vmem>>, vector<1x8xf32>,
    return
  }
  func.func @transform_0(%arg0: i32) -> (i32, i32) {
    %c0_i32 = arith.constant 0 : i32
    %c0_i32_0 = arith.constant 0 : i32
    return %c0_i32, %arg0 : i32, i32
  }
  func.func @transform_1(%arg0: i32) -> (i32, i32) {
    %c0_i32 = arith.constant 0 : i32
    %c0_i32_0 = arith.constant 0 : i32
    return %c0_i32, %arg0 : i32, i32
  }
  func.func @transform_2(%arg0: i32) -> (i32, i32) {
    %c0_i32 = arith.constant 0 : i32
    %c0_i32_0 = arith.constant 0 : i32
    %c0_i32_1 = arith.constant 0 : i32
    return %c0_i32, %c0_i32_0 : i32, i32
  }
  func.func @transform_3(%arg0: i32) -> (i32, i32) {
    %c0_i32 = arith.constant 0 : i32
    %c0_i32_0 = arith.constant 0 : i32
    %c0_i32_1 = arith.constant 0 : i32
    return %c0_i32, %c0_i32_0 : i32, i32
  }
  func.func @transform_4(%arg0: i32) -> (i32, i32) {
    %c0_i32 = arith.constant 0 : i32
    %c0_i32_0 = arith.constant 0 : i32
    %c0_i32_1 = arith.constant 0 : i32
    return %c0_i32, %c0_i32_0 : i32, i32
  }
  func.func @transform_5(%arg0: i32) -> (i32, i32) {
    %c0_i32 = arith.constant 0 : i32
    %c0_i32_0 = arith.constant 0 : i32
    %c0_i32_1 = arith.constant 0 : i32
    return %c0_i32, %c0_i32_0 : i32, i32
  }
  func.func @transform_6(%arg0: i32) -> (i32, i32) {
    %c0_i32 = arith.constant 0 : i32
    %c0_i32_0 = arith.constant 0 : i32
    %c0_i32_1 = arith.constant 0 : i32
    return %c0_i32, %c0_i32_0 : i32, i32
  }
  func.func @transform_7(%arg0: i32) -> (i32, i32) {
    %c0_i32 = arith.constant 0 : i32
    %c0_i32_0 = arith.constant 0 : i32
    %c0_i32_1 = arith.constant 0 : i32
    return %c0_i32, %c0_i32_0 : i32, i32
  }
  func.func @transform_8(%arg0: i32) -> (i32, i32) {
    %c0_i32 = arith.constant 0 : i32
    %c0_i32_0 = arith.constant 0 : i32
    %c0_i32_1 = arith.constant 0 : i32
    return %c0_i32, %c0_i32_0 : i32, i32
  }
  func.func @transform_9(%arg0: i32) -> (i32, i32) {
    %c0_i32 = arith.constant 0 : i32
    %c0_i32_0 = arith.constant 0 : i32
    return %c0_i32, %arg0 : i32, i32
  }
}

</mosaic_0001>

<bundles_post_ra>
// kernel: critic_forward.1
= control target key start
LH: loop header
LB: loop body
LE: loop exit
PB: predicated region body
PF: predicated region fallthrough
CT: control target
= control target key end

     0   :  { %s482_s0 = inlined_call_operand.vmem [shape: f32[3,8], index: 0, kind: input, shape index: {}]   ;;  %s483_s1 = inlined_call_operand.vmem [shape: f32[1,8], index: 1, kind: input, shape index: {}]   ;;  %s484_s2 = inlined_call_operand.vmem [shape: f32[32,3], index: 2, kind: input, shape index: {}]   ;;  %s485_s3 = inlined_call_operand.vmem [shape: f32[32,1], index: 3, kind: input, shape index: {}]   ;;  %s486_s4 = inlined_call_operand.vmem [shape: f32[32,1], index: 4, kind: input, shape index: {}]   ;;  %s487_s5 = inlined_call_operand.vmem [shape: f32[32,32], index: 5, kind: input, shape index: {}]   ;;  %s488_s6 = inlined_call_operand.vmem [shape: f32[32,1], index: 6, kind: input, shape index: {}]   ;;  %s489_s7 = inlined_call_operand.vmem [shape: f32[1,32], index: 7, kind: input, shape index: {}]   ;;  %s490_s8 = inlined_call_operand.<no memory space> [shape: f32[1,1], index: 8, kind: input, shape index: {}]   ;;  %s491_s9 = inlined_call_operand.hbm [shape: f32[1,8], index: 9, kind: output, shape index: {}]  }
   0x1   :  { %v14_v0 = vstv %s490_s8 }
   0x2   :  { %15 = vst [vmem:[#allocation2] sm:$0x1] %v14_v0 }
   0x3   :  { %v36_v1 = vld [vmem:[%s483_s1] sm:$0x1]  ;;  %vm58_vm0 = vcmask 1040384   ;;  %vm104_vm1 = vcmask 1042432   ;;  %vm45_vm2 = vcmask 7168   ;;  %vm91_vm3 = vcmask 23552  }
   0x4   :  { %v35_v2 = vld [vmem:[%s482_s0] sm:$0x7]  ;;  %292 = vmatpush.msk.msra.mxu0 %vm58_vm0, %v36_v1  ;;  %v138_v5 = vld [vmem:[%s486_s4 + $0x8] sm:$0xff]  ;;  %v342_v6 = vmov 0   ;;  %v140_v7 = vld [vmem:[%s486_s4 + $0x18] sm:$0xff] }
   0x5   :  { %297 = vmatpush.msk.msra.mxu1 %vm104_vm1, %v35_v2  ;;  %v41_v3 = vld [vmem:[%s485_s3] sm:$0xff]  ;;  %314 = vset.pattern.permute.xlu1 %v342_v6 }
   0x6   :  { %v37_v4 = vld [vmem:[%s484_s2] sm:$0xff]  ;;  %293 = vmatmul.msk.f32.vlgmr.msra.gmra.mxu0 %vm45_vm2, %v41_v3  ;;  %313 = vset.pattern.permute.xlu0 %v342_v6 }
   0x7   :  { %298 = vmatmul.msk.f32.vlgmr.msra.gmra.mxu1 %vm91_vm3, %v37_v4  ;;  %148 = vperm.xlu1 %314, %v138_v5  }
   0x8   :  { %158 = vperm.xlu0 %313, %v140_v7   ;;  %315 = vset.pattern.permute.xlu2 %v342_v6 }
   0x9   :  { %16 = vsyncpa [#allocation4], 0  ;;  %v42_v8 = vld [vmem:[%s485_s3 + $0x8] sm:$0xff]  ;;  %v137_v10 = vld [vmem:[%s486_s4] sm:$0xff]  ;;  %vm197_vm4 = vcmask 261120   ;;  %s343_s25 = smov [#allocation3]  }
   0xa   :  { %v38_v9 = vld [vmem:[%s484_s2 + $0x8] sm:$0xff]  ;;  %v139_v11 = vld [vmem:[%s486_s4 + $0x10] sm:$0xff]  ;;  %v173_v15 = vld [vmem:[%s488_s6] sm:$0xff]  ;;  %s281_s26 = sshll.u32 %s343_s25, 4  ;;  %s283_s29 = sshll.u32 %s491_s9, 4  ;;  %vm274_vm5 = vcmask 57344   ;;  %s282_s26 = int_to_ptr.vmem [resolvable:$true] %s281_s26  ;;  %s284_s29 = int_to_ptr.hbm [resolvable:$true] %s283_s29 }
   0xb   :  { %v43_v12 = vld [vmem:[%s485_s3 + $0x10] sm:$0xff]  ;;  %v174_v14 = vld [vmem:[%s488_s6 + $0x8] sm:$0xff]  ;;  %v44_v16 = vld [vmem:[%s485_s3 + $0x18] sm:$0xff] }
   0xc   :  { %v39_v13 = vld [vmem:[%s484_s2 + $0x10] sm:$0xff]  ;;  %v40_v17 = vld [vmem:[%s484_s2 + $0x18] sm:$0xff]  ;;  %v169_v44 = vld [vmem:[%s487_s5] sm:$0xff] }
   0xd   :  { %v176_v26 = vld [vmem:[%s488_s6 + $0x18] sm:$0xff]  ;;  %v175_v39 = vld [vmem:[%s488_s6 + $0x10] sm:$0xff]  ;;  %v244_v46 = vld [vmem:[#allocation2] sm:$0x1] }
   0xe   :  { %294 = vmatmul.msk.f32.gmra.mxu0 %vm45_vm2, %v42_v8  ;;  %194 = vperm.xlu2 %315, %v176_v26   ;;  %v172_v45 = vld [vmem:[%s487_s5 + $0x18] sm:$0xff]  ;;  %v170_v47 = vld [vmem:[%s487_s5 + $0x8] sm:$0xff]  ;;  %v171_v48 = vld [vmem:[%s487_s5 + $0x10] sm:$0xff] }
   0xf   :  { %299 = vmatmul.msk.f32.gmra.mxu1 %vm91_vm3, %v38_v9  ;;  %143 = vperm.xlu1 %314, %v137_v10   ;;  %v243_v1 = vld [vmem:[%s489_s7] sm:$0x1] }
  0x10   :  { %153 = vperm.xlu0 %313, %v139_v11  }
  0x16   :  { %295 = vmatmul.msk.f32.gmra.mxu0 %vm45_vm2, %v43_v12  ;;  %189 = vperm.xlu2 %315, %v175_v39  }
  0x17   :  { %300 = vmatmul.msk.f32.gmra.mxu1 %vm91_vm3, %v39_v13  ;;  %179 = vperm.xlu1 %314, %v173_v15  }
  0x18   :  { %184 = vperm.xlu0 %313, %v174_v14  }
  0x1e   :  { %296 = vmatmul.msk.f32.gmra.mxu0 %vm45_vm2, %v44_v16  ;;  %247 = vperm.xlu2 %315, %v244_v46  }
  0x1f   :  { %301 = vmatmul.msk.f32.gmra.mxu1 %vm91_vm3, %v40_v17 }
  0x68   :  { %v195_v49 = vpop.permute.xlu2 %194 }
  0x70   :  { %v190_v56 = vpop.permute.xlu2 %189 }
  0x78   :  { %v248_v2 = vpop.permute.xlu2 %247 }
  0x79   :  { %v149_v25 = vpop.permute.xlu1 %148  ;;  %v250_v3 = vperm.slane %v248_v2, 0 }
  0x7a   :  { %v159_v22 = vpop.permute.xlu0 %158 }
  0x81   :  { %v144_v36 = vpop.permute.xlu1 %143 }
  0x82   :  { %v154_v32 = vpop.permute.xlu0 %153 }
  0x83   :  { %v79_v18 = vpop.f32.mrf.mxu0 }
  0x84   :  { %v125_v19 = vpop.f32.mrf.mxu1 }
  0x85   :  { %v126_v33 = vadd.f32 %v125_v19, %v79_v18 }
  0x87   :  { %v161_v40 = vadd.f32 %v144_v36, %v126_v33 }
  0x89   :  { %v165_v43 = vmax.f32 %v161_v40, 0.0  ;;  %v180_v60 = vpop.permute.xlu1 %179 }
  0x8a   :  { %v185_v55 = vpop.permute.xlu0 %184 }
  0x8b   :  { %v82_v20 = vpop.f32.mrf.mxu0 }
  0x8c   :  { %v128_v21 = vpop.f32.mrf.mxu1 }
  0x8d   :  { %v129_v30 = vadd.f32 %v128_v21, %v82_v20 }
  0x8f   :  { %v162_v38 = vadd.f32 %v149_v25, %v129_v30 }
  0x91   :  { %v166_v42 = vmax.f32 %v162_v38, 0.0 }
  0x93   :  { %v85_v23 = vpop.f32.mrf.mxu0 }
  0x94   :  { %v131_v24 = vpop.f32.mrf.mxu1 }
  0x95   :  { %v132_v27 = vadd.f32 %v131_v24, %v85_v23 }
  0x97   :  { %v163_v35 = vadd.f32 %v154_v32, %v132_v27 }
  0x99   :  { %v167_v41 = vmax.f32 %v163_v35, 0.0 }
  0x9b   :  { %v88_v28 = vpop.f32.mrf.mxu0 }
  0x9c   :  { %v134_v29 = vpop.f32.mrf.mxu1 }
  0x9d   :  { %v135_v31 = vadd.f32 %v134_v29, %v88_v28 }
  0x9f   :  { %v164_v34 = vadd.f32 %v159_v22, %v135_v31 }
  0xa1   :  { %v168_v37 = vmax.f32 %v164_v34, 0.0 }
  0xa3   :  { %222 = vmatpush.msra.mxu2 %v168_v37  ;;  %307 = vmatpush.msra.mxu3 %v168_v37 }
  0xa5   :  { %223 = vmatpush.msra.mxu2 %v167_v41  ;;  %308 = vmatpush.msra.mxu3 %v167_v41 }
  0xa7   :  { %224 = vmatpush.msra.mxu2 %v166_v42  ;;  %309 = vmatpush.msra.mxu3 %v166_v42 }
  0xa9   :  { %225 = vmatpush.msra.mxu2 %v165_v43  ;;  %310 = vmatpush.msra.mxu3 %v165_v43 }
  0xaa   :  { %302 = vmatmul.msk.f32.vlgmr.msra.gmra.mxu2 %vm197_vm4, %v169_v44  ;;  %305 = vmatmul.msk.f32.vlgmr.msra.gmra.mxu3 %vm197_vm4, %v172_v45 }
  0xb2   :  { %303 = vmatmul.msk.f32.gmra.mxu2 %vm197_vm4, %v170_v47 }
  0xba   :  { %304 = vmatmul.msk.f32.gmra.mxu2 %vm197_vm4, %v171_v48 }
 0x12d   :  { %v227_v50 = vpop.f32.mrf.mxu2  ;;  %v236_v51 = vpop.f32.mrf.mxu3 }
 0x12e   :  { %v237_v52 = vadd.f32 %v236_v51, %v195_v49  ;;  %v228_v61 = vadd.f32 %v227_v50, %v180_v60 }
 0x130   :  { %v242_v53 = vmax.f32 %v237_v52, 0.0  ;;  %v239_v0 = vmax.f32 %v228_v61, 0.0 }
 0x132   :  { %266 = vmatpush.msrb.mxu3 %v242_v53 }
 0x135   :  { %v230_v54 = vpop.f32.mrf.mxu2 }
 0x136   :  { %v231_v58 = vadd.f32 %v230_v54, %v185_v55 }
 0x138   :  { %v240_v63 = vmax.f32 %v231_v58, 0.0 }
 0x13d   :  { %v233_v57 = vpop.f32.mrf.mxu2 }
 0x13e   :  { %v234_v59 = vadd.f32 %v233_v57, %v190_v56 }
 0x140   :  { %v241_v62 = vmax.f32 %v234_v59, 0.0 }
 0x142   :  { %267 = vmatpush.msrb.mxu3 %v241_v62 }
 0x144   :  { %268 = vmatpush.msrb.mxu3 %v240_v63 }
 0x146   :  { %269 = vmatpush.msrb.mxu3 %v239_v0 }
 0x147   :  { %306 = vmatmul.msk.f32.vlgmr.msrb.gmra.mxu3 %vm197_vm4, %v243_v1 }
 0x1ca   :  { %v271_v4 = vpop.f32.mrf.mxu3 }
 0x1cb   :  { %v272_v5 = vadd.f32 %v271_v4, %v250_v3 }
 0x1cd   :  { %275 = vst.msk [vmem:[#allocation3] sm:$0x1] %vm274_vm5, %v272_v5 }
 0x1ce   :  { %286 = dma.vmem_to_hbm [thread:$0]  %s282_s26, 16, %s284_s29, [#allocation4]  }
 0x1cf   :  { %340 = dma.done.wait [#allocation4], 16  }
 0x1d0   :  { %341 = vsyncadd [#allocation4], 4294967280 }
 0x1d1   :  { %291 = vsyncpa [#allocation4], 1 }

</bundles_post_ra>
